<compile_context>
chip_gen: v6e
topology: v6e:2x2x1
jax: 0.10.0
libtpu: 0.0.40
codegen_flags: <defaults>
</compile_context>

<pallas_src>
import jax
import jax.numpy as jnp
from jax.experimental import pallas as pl
from jax.experimental.pallas import tpu as pltpu


def _drop_path_kernel(scale_ref, x_ref, o_ref):
    # scale_ref: (TB, 1) f32 per-sample scale (0.0 or 1/keep_prob)
    # x_ref/o_ref: (TB, TM) lane-dense activation tile
    # Compute in f32 and cast once per tile (keeps exact parity with the f32
    # reference; v5e has no bf16 VPU path anyway and the kernel is HBM-bound).
    o_ref[...] = (x_ref[...].astype(jnp.float32) * scale_ref[...]).astype(o_ref.dtype)


# ~4 MiB per x tile: double-buffered input + output is ~16 MiB of VMEM, which
# fits comfortably under the explicit 48 MiB vmem limit on every generation
# (v7x physical VMEM per TC is 64 MiB; v5e/v6e have 128 MiB).
_TARGET_TILE_BYTES = 4 * 1024 * 1024
_VMEM_LIMIT_BYTES = 48 * 1024 * 1024


def _choose_tiles(B, M, itemsize):
    """Pick (tb, tm) block sizes for a (B, M) lane-dense stream."""
    # Native sublane packing: 8 rows for 32-bit, 16 for 16-bit, 32 for 8-bit.
    pack = max(8, 32 // itemsize)
    # Lane-rounded feature width used only for tile sizing; the grid itself
    # uses cdiv(M, tm) and Pallas masks the partial boundary tile.
    m_lanes = ((M + 127) // 128) * 128

    if B < pack:
        tb = B  # full-dim exception for tiny batches
    else:
        tb = pack

    tm = (_TARGET_TILE_BYTES // (tb * itemsize)) // 128 * 128
    tm = max(128, min(m_lanes, tm))

    if B >= pack:
        # Re-grow tb (multiples of the packing) until the tile hits the byte
        # target — matters for wide-batch / narrow-feature shapes.
        max_tb = (B // pack) * pack
        while tb < max_tb and tb * tm * itemsize < _TARGET_TILE_BYTES:
            tb += pack
        tb = min(tb, max_tb)

    # v7x megacore: make sure at least 2 grid blocks exist along a parallel
    # axis so both TensorCores get work.
    nb = pl.cdiv(B, tb)
    nm = pl.cdiv(M, tm)
    if nb * nm == 1:
        if tm > 128:
            tm = max(128, ((tm // 2) // 128) * 128)
        elif B >= 2 * pack:
            tb = max(pack, ((tb // 2) // pack) * pack)
    return tb, tm


def drop_path_pallas(x, *, drop_prob: float, training: bool, key, donate_x: bool = False):
    """Pallas implementation of DropPath.forward(x).

    donate_x=True aliases x's buffer as the output (in-place).  Only enable it
    when the caller actually donates/owns the buffer; otherwise XLA inserts a
    defensive copy and HBM traffic doubles.
    """
    if drop_prob == 0.0 or not training:
        return x

    keep_prob = 1.0 - drop_prob
    orig_shape = x.shape
    B = x.shape[0]
    M = 1
    for d in x.shape[1:]:
        M *= d

    # Per-sample uniform draws -> per-sample scale, precomputed in the wrapper
    # (B f32 scalars).  RNG stays in plain JAX glue so the kernel result is
    # deterministic w.r.t. the provided PRNG key.
    rand = jax.random.uniform(key, (B,), dtype=jnp.float32)
    keep = jnp.floor(keep_prob + rand)                       # 0.0 or 1.0
    scale = (keep / jnp.float32(keep_prob)).reshape(B, 1)    # 0.0 or 1/keep_prob

    # Lane-dense 2D layout.  No padding: Pallas masks the partial boundary
    # tile when M is not a multiple of tm, so ragged shapes cost no extra HBM.
    x2 = x.reshape(B, M)

    itemsize = jnp.dtype(x.dtype).itemsize
    tb, tm = _choose_tiles(B, M, itemsize)
    grid = (pl.cdiv(B, tb), pl.cdiv(M, tm))

    alias = {1: 0} if donate_x else {}

    out = pl.pallas_call(
        _drop_path_kernel,
        out_shape=jax.ShapeDtypeStruct((B, M), x.dtype),
        grid_spec=pltpu.PrefetchScalarGridSpec(
            num_scalar_prefetch=0,
            grid=grid,
            in_specs=[
                pl.BlockSpec((tb, 1), lambda i, j: (i, 0)),    # per-sample scale
                pl.BlockSpec((tb, tm), lambda i, j: (i, j)),   # activations
            ],
            out_specs=pl.BlockSpec((tb, tm), lambda i, j: (i, j)),
        ),
        compiler_params=pltpu.CompilerParams(
            dimension_semantics=("parallel", "parallel"),
            vmem_limit_bytes=_VMEM_LIMIT_BYTES),
        input_output_aliases=alias,
    )(scale, x2)

    return out.reshape(orig_shape)


def drop_path_reference(x, rand, drop_prob):
    """Pure-JAX reference mirroring the PyTorch drop_path (f32 math, cast back)."""
    keep_prob = 1.0 - drop_prob
    keep = jnp.floor(keep_prob + rand.astype(jnp.float32))
    scale = keep / jnp.float32(keep_prob)
    shape = (x.shape[0],) + (1,) * (x.ndim - 1)
    return (x.astype(jnp.float32) * scale.reshape(shape)).astype(x.dtype)


if __name__ == "__main__":
    key = jax.random.PRNGKey(0)
    k_x, k_drop, k_x2, k_x3 = jax.random.split(key, 4)
    drop_prob = 0.3

    # Case 1: small ViT-style token tensor (batch=2, seq=8, hidden=32), f32.
    B, N, D = 2, 8, 32
    x = jax.random.normal(k_x, (B, N, D), dtype=jnp.float32)
    y = jax.block_until_ready(
        drop_path_pallas(x, drop_prob=drop_prob, training=True, key=k_drop))
    rand = jax.random.uniform(k_drop, (B,), dtype=jnp.float32)
    y_ref = drop_path_reference(x, rand, drop_prob)
    assert jnp.allclose(y, y_ref, atol=1e-6, rtol=1e-6), "f32 mismatch vs reference"

    # Case 2: batch multiple of 8, lane-aligned hidden, bf16 (tiled sublane path).
    B2, N2, D2 = 8, 16, 128
    xb = jax.random.normal(k_x2, (B2, N2, D2), dtype=jnp.bfloat16)
    yb = jax.block_until_ready(
        drop_path_pallas(xb, drop_prob=drop_prob, training=True, key=k_drop))
    rand2 = jax.random.uniform(k_drop, (B2,), dtype=jnp.float32)
    yb_ref = drop_path_reference(xb, rand2, drop_prob)
    assert jnp.allclose(yb.astype(jnp.float32), yb_ref.astype(jnp.float32),
                        atol=1e-6, rtol=1e-6), "bf16 mismatch vs reference"

    # Case 3: ragged non-batch dims (exercises the masked boundary-tile path,
    # no pad / slice extra passes anymore).
    B3, N3, D3 = 3, 5, 7
    xr = jax.random.normal(k_x3, (B3, N3, D3), dtype=jnp.float32)
    yr = jax.block_until_ready(
        drop_path_pallas(xr, drop_prob=drop_prob, training=True, key=k_drop))
    rand3 = jax.random.uniform(k_drop, (B3,), dtype=jnp.float32)
    yr_ref = drop_path_reference(xr, rand3, drop_prob)
    assert jnp.allclose(yr, yr_ref, atol=1e-6, rtol=1e-6), "ragged mismatch vs reference"

    # Eval path (identity, no kernel launched).
    y_eval = jax.block_until_ready(
        drop_path_pallas(x, drop_prob=drop_prob, training=False, key=k_drop))
    assert jnp.array_equal(y_eval, x), "eval mode must be identity"

    print("KERNEL_OK")
</pallas_src>

<mosaic_0001>
module attributes {stable_mosaic.version = 11 : i64} {
  func.func @_drop_path_kernel(%arg0: i32, %arg1: i32, %arg2: memref<2x1xf32, #tpu.memory_space<vmem>>, %arg3: memref<2x128xf32, #tpu.memory_space<vmem>>, %arg4: memref<2x128xf32, #tpu.memory_space<vmem>>) attributes {dimension_semantics = [#tpu.dimension_semantics<parallel>, #tpu.dimension_semantics<parallel>], iteration_bounds = array<i64: 1, 2>, scalar_prefetch = 0 : i64, scratch_operands = 0 : i64, tpu.core_type = #tpu.core_type<tc>, window_params = [{transform_indices = @transform_0, window_bounds = array<i64: 2, 1>}, {transform_indices = @transform_1, window_bounds = array<i64: 2, 128>}, {transform_indices = @transform_2, window_bounds = array<i64: 2, 128>}]} {
    %c0 = arith.constant 0 : index
    %c0_0 = arith.constant 0 : index
    %0 = vector.load %arg3[%c0, %c0_0] : memref<2x128xf32, #tpu.memory_space<vmem>>, vector<2x128xf32>
    %c0_1 = arith.constant 0 : index
    %c0_2 = arith.constant 0 : index
    %1 = vector.load %arg2[%c0_1, %c0_2] : memref<2x1xf32, #tpu.memory_space<vmem>>, vector<2x1xf32>
    %2 = vector.broadcast %1 : vector<2x1xf32> to vector<2x128xf32>
    %3 = arith.mulf %0, %2 : vector<2x128xf32>
    %c0_3 = arith.constant 0 : index
    %c0_4 = arith.constant 0 : index
    %4 = vector.load %arg4[%c0_3, %c0_4] : memref<2x128xf32, #tpu.memory_space<vmem>>, vector<2x128xf32>
    tpu.vector_store %arg4[%c0_3, %c0_4], %3 {strides = array<i32>} : memref<2x128xf32, #tpu.memory_space<vmem>>, vector<2x128xf32>,
    return
  }
  func.func @transform_0(%arg0: i32, %arg1: i32) -> (i32, i32) {
    %c0_i32 = arith.constant 0 : i32
    %c0_i32_0 = arith.constant 0 : i32
    return %arg0, %c0_i32 : i32, i32
  }
  func.func @transform_1(%arg0: i32, %arg1: i32) -> (i32, i32) {
    %c0_i32 = arith.constant 0 : i32
    return %arg0, %arg1 : i32, i32
  }
  func.func @transform_2(%arg0: i32, %arg1: i32) -> (i32, i32) {
    %c0_i32 = arith.constant 0 : i32
    return %arg0, %arg1 : i32, i32
  }
}

</mosaic_0001>

<bundles_post_ra>
// kernel: tpu_custom_call.1
= control target key start
LH: loop header
LB: loop body
LE: loop exit
PB: predicated region body
PF: predicated region fallthrough
CT: control target
= control target key end

     0   :  { %7 = vsyncpa [#allocation3], 0  ;;  %s565_s0 = inlined_call_operand.vmem [shape: f32[2,1], index: 0, kind: input, shape index: {}]   ;;  %s566_s1 = inlined_call_operand.vmem [shape: f32[2,256], index: 1, kind: input, shape index: {}]   ;;  %s567_s2 = inlined_call_operand.hbm [shape: f32[2,256], index: 2, kind: output, shape index: {}]  }
   0x1   :  { %9 = vsyncpa [#allocation3 + $0x1], 0  ;;  %s463_s9 = smov 0   ;;  %s465_s10 = smov 0  }
   0x2   :  { %s467_s11 = smov 0   ;;  %s469_s12 = smov 0  }
   0x3   :  { %s471_s13 = smov 0   ;;  %s473_s14 = smov 0  }
   0x4 LB: > { %s299_s15 = sadd.s32 4294967295, %s444_s14   ;;  %s300_s16 = sadd.s32 4294967294, %s444_s14   ;;  %s444_s14 = sphi %s473_s14, %s15_s14   ;;  %s440_s13 = sphi %s471_s13, %s574_s13   ;;  %s436_s12 = sphi %s469_s12, %s573_s12   ;;  %s432_s11 = sphi %s467_s11, %s572_s11   ;;  %s428_s10 = sphi %s465_s10, %s571_s10   ;;  %s424_s9 = sphi %s463_s9, %s570_s9  }
   0x5   : > { %s24_s17 = sadd.s32 1, %s440_s13  ;;  %s90_s18 = sadd.s32 1, %s432_s11 }
   0x6   : > { %p25_p0 = scmp.ge.s32.totalorder %s24_s17, 2  ;;  %p100_p1 = scmp.ne.s32.totalorder %s432_s11, %s428_s10 }
   0x7   : > { %p101_p2 = scmp.eq.s32.totalorder %s299_s15, 1  ;;  %p106_p3 = scmp.ne.s32.totalorder %s428_s10, %s424_s9 }
   0x8   : > { %s576_s17 = smov (%p25_p0, %s24_s17), 0  ;;  %p107_p5 = scmp.eq.s32.totalorder %s300_s16, 1 }
   0x9   : > { %p503_p4 = por %p101_p2, %p100_p1  ;;  %s86_s20 = ssub.s32 %s440_s13, %s576_s17 }
   0xa   : > { %p304_p6 = scmp.ge.s32.totalorder %s444_s14, 1  ;;  %p88_p7 = scmp.eq.s32.totalorder %s86_s20, 0 }
   0xb   : > { %p510_p8 = por %p107_p5, %p106_p3  ;;  %p143_p9 = scmp.lt.s32.totalorder %s444_s14, 3 }
   0xc   : > { %s516_s22 = scalar_select %p88_p7, %s432_s11, %s90_s18  }
   0xd   : > { %p144_p10 = pnand %p304_p6, %p143_p9 }
   0xe   : > { %p178_p11 = scmp.lt.s32.totalorder (!%p144_p10), %s436_s12, 1  ;;  %s169_s26 = sand.u32 (!%p144_p10), 1, %s428_s10  }
   0xf   : > { %147 = sbr.rel (%p144_p10) target bundleno = 161 (0xa1), region = 28  ;;  %s305_s27 = sshll.u32 (!%p144_p10), %s169_s26, 1 }
  0x10   : > { %s308_s4 = sshll.u32 (!%p144_p10), %s436_s12, 5  ;;  %s171_s5 = scalar_lea.vmem (!%p144_p10), [#allocation2], %s305_s27 }
  0x11   : > { %s209_s6 = sshll.u32 (!%p144_p10), %s171_s5, 4  ;;  %s207_s15 = scalar_lea.hbm (!%p144_p10), %s567_s2, %s308_s4  ;;  %s210_s6 = int_to_ptr.vmem [resolvable:$true] %s209_s6 }
  0x12   : > { %s194_s16 = scalar_lea.sflag (!%p144_p10), [#allocation3], %s169_s26  ;;  %s368_s18 = scalar_lea.vmem (!%p144_p10), %s210_s6, 32 }
  0x13   : > { %p369_p12 = scmp.ne.s32.totalorder (!%p144_p10), %s210_s6, %s368_s18  ;;  %s447_s20 = smov (!%p144_p10), [#allocation2]  }
  0x14   : > { %v185_v0 = vld [vmem:[%s565_s0] sm:$0x3]  ;;  %v446_v1 = vmov 0   ;;  %s179_s25 = scalar_select %p178_p11, %s436_s12, 1 }
  0x15   : > { %367 = vset.pattern.permute.xlu0 %v446_v1  ;;  %p370_p13 = pnand %p369_p12, %p503_p4  ;;  %s372_s23 = sshll.u32 %s447_s20, 4  ;;  %s373_s23 = int_to_ptr.vmem [resolvable:$false] %s372_s23 }
  0x16   : > { %188 = vperm.xlu0 %367, %v185_v0   ;;  %s306_s28 = sshll.u32 %s179_s25, 1  ;;  %s374_s12 = scalar_lea.vmem %s373_s23, 64 }
  0x17   : > { %s183_s3 = scalar_lea.vmem %s566_s1, %s306_s28  ;;  %p371_p0 = pneg %p370_p13 }
  0x18   : > { %v184_v2 = vld [vmem:[%s183_s3] sm:$0x3]  ;;  %p375_p1 = scmp.lt.s32.totalorder %s210_s6, %s373_s23  ;;  %p376_p2 = scmp.lt.s32.totalorder %s374_s12, %s368_s18 }
  0x1a   : > { %p377_p3 = por %p376_p2, %p375_p1 }
  0x1c   : > { %p378_p5 = pnand %p377_p3, %p371_p0 }
  0x91   : > { %v189_v3 = vpop.permute.xlu0 %188 }
  0x92   : > { %v191_v4 = vmul.f32 %v189_v3, %v184_v2 }
  0x94   : > { %192 = vst [vmem:[%s171_s5] sm:$0x3] %v191_v4 }
  0x95   : > { %381 = shalt.err (!%p378_p5)
}
  0x96   : > { %s382_s24 = scalar_lea.hbm %s207_s15, 32  ;;  %s386_s27 = scalar_lea.hbm %s567_s2, 64 }
  0x97   : > { %p383_p6 = scmp.ne.s32.totalorder %s207_s15, %s382_s24  ;;  %p387_p10 = scmp.lt.s32.totalorder %s207_s15, %s567_s2 }
  0x98   : > { %p388_p11 = scmp.lt.s32.totalorder %s386_s27, %s382_s24 }
  0x99   : > { %p384_p7 = pnand %p383_p6, %p503_p4 }
  0x9a   : > { %p389_p12 = por %p388_p11, %p387_p10 }
  0x9b   : > { %p385_p9 = pneg %p384_p7 }
  0x9d   : > { %p390_p13 = pnand %p389_p12, %p385_p9 }
  0x9f   : > { %393 = shalt.err (!%p390_p13)
}
  0xa0   : > { %311 = dma.vmem_to_hbm [thread:$0]  (%p503_p4), %s210_s6, 32, %s207_s15, %s194_s16  }
  0xa1 PF: > { %p317_p0 = scmp.ge.s32.totalorder %s444_s14, 2  ;;  %s221_s30 = sand.u32 1, %s424_s9  }
  0xa2   : > { %s222_s3 = scalar_lea.sflag [#allocation3], %s221_s30 }
  0xa3   : > { %p314_p1 = pnand %p317_p0, %p510_p8 }
  0xa5   : > { %p315_p2 = pneg %p314_p1 }
  0xa7   : > { %419 = dma.done.wait (%p315_p2), %s222_s3, 32  }
  0xa8   : > { %421 = vsyncadd (%p315_p2), %s222_s3, 4294967264  ;;  %s15_s14 = sadd.s32 1, %s444_s14   ;;  %s570_s9 = smov %s428_s10 }
  0xa9   : > { %p12_p3 = scmp.ge.s32.totalorder %s15_s14, 4   ;;  %s571_s10 = smov %s432_s11 }
  0xaa   : > { %s572_s11 = smov %s516_s22  ;;  %s573_s12 = smov %s440_s13 }
  0xab   : > { %s574_s13 = smov %s576_s17  ;;  %14 = sbr.rel (!%p12_p3) target bundleno = 4 (0x4), region = 66 }
  0xb0   :  { %227 = vsyncpa [#allocation3], 1 }
  0xb1   :  { %229 = vsyncpa [#allocation3 + $0x1], 1 }

</bundles_post_ra>
